<compile_context>
chip_gen: v5e
topology: v5e:2x2
jax: 0.10.0
libtpu: 0.0.40
codegen_flags: <defaults>
</compile_context>

<pallas_src>
import jax
import jax.numpy as jnp
from jax.experimental import pallas as pl
from jax.experimental.pallas import tpu as pltpu


def _round_up(n, m):
    return ((n + m - 1) // m) * m


def classifier_kernel(x_t_ref, w1_ref, b1_ref, w2_ref, b2_ref, out_ref):
    # x_t_ref : (in_shape, TB)        streaming tile of x^T
    # w1_ref  : (hidden_1, in_shape)  resident (PyTorch fc1.weight layout)
    # b1_ref  : (hidden_1, 1)         resident
    # w2_ref  : (1, hidden_1)         resident (PyTorch fc2.weight layout)
    # b2_ref  : (1,)                  scalar in SMEM
    # out_ref : (1, TB)               lane-dense sigmoid output tile
    x_t = x_t_ref[...].astype(jnp.float32)
    w1 = w1_ref[...].astype(jnp.float32)
    # fc1 + ReLU, computed transposed: (hidden, in) @ (in, TB) -> (hidden, TB)
    h = jnp.dot(w1, x_t, preferred_element_type=jnp.float32) + b1_ref[...]
    h = jnp.maximum(h, 0.0)
    # fc2: (1, hidden) @ (hidden, TB) -> (1, TB); MXU sees a large N dimension.
    logits = jnp.dot(w2_ref[...].astype(jnp.float32), h,
                     preferred_element_type=jnp.float32) + b2_ref[0]
    out_ref[...] = jax.nn.sigmoid(logits)


def classifier_forward(x, w1, b1, w2, b2, *, block_b=2048):
    """Forward pass of the Classifier module.

    x  : any shape whose trailing dims flatten to in_shape (mirrors x.view(-1, in_shape))
    w1 : (hidden_1, in_shape)   -- PyTorch nn.Linear weight layout
    b1 : (hidden_1,)
    w2 : (1, hidden_1)
    b2 : (1,)
    Returns (B, 1) float32, matching torch.sigmoid(fc2(relu(fc1(x)))).
    """
    hidden_1, in_shape = w1.shape
    x2d = x.reshape(-1, in_shape)
    B = x2d.shape[0]

    # Tile the batch on the lane axis. TB is a multiple of 128; pad B up to a
    # multiple of TB (zero padding is harmless: extra columns are sliced off).
    TB = min(block_b, _round_up(B, 128))
    B_pad = _round_up(B, TB)

    x_t = jnp.swapaxes(x2d, 0, 1)            # (in_shape, B) -- layout plumbing only
    if B_pad != B:
        x_t = jnp.pad(x_t, ((0, 0), (0, B_pad - B)))

    b1_col = b1.reshape(hidden_1, 1).astype(jnp.float32)
    b2_s = b2.reshape(1).astype(jnp.float32)

    grid = (B_pad // TB,)

    cost = pl.CostEstimate(
        flops=2 * B_pad * in_shape * hidden_1 + 2 * B_pad * hidden_1,
        transcendentals=B_pad,
        bytes_accessed=(x_t.size * x_t.dtype.itemsize
                        + w1.size * w1.dtype.itemsize
                        + w2.size * w2.dtype.itemsize
                        + hidden_1 * 4 + 4 + B_pad * 4),
    )

    out_t = pl.pallas_call(
        classifier_kernel,
        out_shape=jax.ShapeDtypeStruct((1, B_pad), jnp.float32),
        grid=grid,
        in_specs=[
            pl.BlockSpec((in_shape, TB), lambda i: (0, i)),        # streamed x^T tiles
            pl.BlockSpec((hidden_1, in_shape), lambda i: (0, 0)),  # resident w1
            pl.BlockSpec((hidden_1, 1), lambda i: (0, 0)),         # resident b1
            pl.BlockSpec((1, hidden_1), lambda i: (0, 0)),         # resident w2
            pl.BlockSpec(memory_space=pltpu.MemorySpace.SMEM),     # b2 scalar
        ],
        out_specs=pl.BlockSpec((1, TB), lambda i: (0, i)),
        compiler_params=pltpu.CompilerParams(
            dimension_semantics=("parallel",),                     # megacore on v7x
        ),
        cost_estimate=cost,
    )(x_t, w1, b1_col, w2, b2_s)

    return out_t[0, :B].reshape(B, 1)


if __name__ == "__main__":
    # Small shapes consistent with the module: batch=8, in_shape=32, hidden_1=32.
    B, IN_SHAPE, HIDDEN_1 = 8, 32, 32

    key = jax.random.PRNGKey(0)
    kx, kw1, kb1, kw2, kb2 = jax.random.split(key, 5)

    x = jax.random.normal(kx, (B, IN_SHAPE), dtype=jnp.float32)

    # Deterministic synthetic parameters in PyTorch nn.Linear layout.
    bound1 = 1.0 / jnp.sqrt(IN_SHAPE)
    w1 = jax.random.uniform(kw1, (HIDDEN_1, IN_SHAPE), minval=-bound1, maxval=bound1,
                            dtype=jnp.float32)
    b1 = jax.random.uniform(kb1, (HIDDEN_1,), minval=-bound1, maxval=bound1,
                            dtype=jnp.float32)
    bound2 = 1.0 / jnp.sqrt(HIDDEN_1)
    w2 = jax.random.uniform(kw2, (1, HIDDEN_1), minval=-bound2, maxval=bound2,
                            dtype=jnp.float32)
    b2 = jax.random.uniform(kb2, (1,), minval=-bound2, maxval=bound2,
                            dtype=jnp.float32)

    # Pure-JAX reference (same math as the PyTorch forward).
    def ref_fn(xx):
        return jax.nn.sigmoid(jnp.maximum(xx @ w1.T + b1, 0.0) @ w2.T + b2)

    # 1) Small batch (single grid step after padding to 128 lanes).
    out = classifier_forward(x, w1, b1, w2, b2)
    out = jax.block_until_ready(out)
    assert out.shape == (B, 1)
    assert jnp.allclose(out, ref_fn(x), atol=1e-5, rtol=1e-5)

    # 2) Exercise the multi-step streamed path (grid > 1) with a small block size.
    B2 = 300
    x_big = jax.random.normal(jax.random.PRNGKey(1), (B2, IN_SHAPE), dtype=jnp.float32)
    out_big = classifier_forward(x_big, w1, b1, w2, b2, block_b=128)
    out_big = jax.block_until_ready(out_big)
    assert out_big.shape == (B2, 1)
    assert jnp.allclose(out_big, ref_fn(x_big), atol=1e-5, rtol=1e-5)

    print("KERNEL_OK")
</pallas_src>

<mosaic_0001>
module attributes {stable_mosaic.version = 11 : i64} {
  func.func @classifier_kernel(%arg0: i32, %arg1: memref<32x128xf32, #tpu.memory_space<vmem>>, %arg2: memref<32x32xf32, #tpu.memory_space<vmem>>, %arg3: memref<32x1xf32, #tpu.memory_space<vmem>>, %arg4: memref<1x32xf32, #tpu.memory_space<vmem>>, %arg5: memref<1xf32, #tpu.memory_space<smem>>, %arg6: memref<1x128xf32, #tpu.memory_space<vmem>>) attributes {dimension_semantics = [#tpu.dimension_semantics<parallel>], iteration_bounds = array<i64: 1>, scalar_prefetch = 0 : i64, scratch_operands = 0 : i64, tpu.core_type = #tpu.core_type<tc>, window_params = [{transform_indices = @transform_0, window_bounds = array<i64: 32, 128>}, {pipeline_mode = #tpu.pipeline_mode<synchronous>, transform_indices = @transform_1, window_bounds = array<i64: 32, 32>}, {pipeline_mode = #tpu.pipeline_mode<synchronous>, transform_indices = @transform_2, window_bounds = array<i64: 32, 1>}, {pipeline_mode = #tpu.pipeline_mode<synchronous>, transform_indices = @transform_3, window_bounds = array<i64: 1, 32>}, {transform_indices = @transform_4, window_bounds = array<i64: 1>}, {transform_indices = @transform_5, window_bounds = array<i64: 1, 128>}]} {
    %c0 = arith.constant 0 : index
    %c0_0 = arith.constant 0 : index
    %0 = vector.load %arg1[%c0, %c0_0] : memref<32x128xf32, #tpu.memory_space<vmem>>, vector<32x128xf32>
    %c0_1 = arith.constant 0 : index
    %c0_2 = arith.constant 0 : index
    %1 = vector.load %arg2[%c0_1, %c0_2] : memref<32x32xf32, #tpu.memory_space<vmem>>, vector<32x32xf32>
    %cst = arith.constant dense<0.000000e+00> : vector<32x128xf32>
    %2 = tpu.matmul %1, %0, %cst {dimension_numbers = #tpu.dot_dimension_numbers<[1], [0], [0], [1], [0, 0, 1, 1], [], []>} : vector<32x32xf32>, vector<32x128xf32>, vector<32x128xf32> -> vector<32x128xf32>
    %c0_3 = arith.constant 0 : index
    %c0_4 = arith.constant 0 : index
    %3 = vector.load %arg3[%c0_3, %c0_4] : memref<32x1xf32, #tpu.memory_space<vmem>>, vector<32x1xf32>
    %4 = vector.broadcast %3 : vector<32x1xf32> to vector<32x128xf32>
    %5 = arith.addf %2, %4 : vector<32x128xf32>
    %cst_5 = arith.constant 0.000000e+00 : f32
    %6 = vector.broadcast %cst_5 : f32 to vector<32x128xf32>
    %7 = arith.maximumf %5, %6 : vector<32x128xf32>
    %c0_6 = arith.constant 0 : index
    %c0_7 = arith.constant 0 : index
    %8 = vector.load %arg4[%c0_6, %c0_7] : memref<1x32xf32, #tpu.memory_space<vmem>>, vector<1x32xf32>
    %cst_8 = arith.constant dense<0.000000e+00> : vector<1x128xf32>
    %9 = tpu.matmul %8, %7, %cst_8 {dimension_numbers = #tpu.dot_dimension_numbers<[1], [0], [0], [1], [0, 0, 1, 1], [], []>} : vector<1x32xf32>, vector<32x128xf32>, vector<1x128xf32> -> vector<1x128xf32>
    %c0_9 = arith.constant 0 : index
    %10 = memref.load %arg5[%c0_9] : memref<1xf32, #tpu.memory_space<smem>>
    %11 = vector.broadcast %10 : f32 to vector<1x128xf32>
    %12 = arith.addf %9, %11 : vector<1x128xf32>
    %13 = arith.negf %12 : vector<1x128xf32>
    %14 = math.exp %13 : vector<1x128xf32>
    %cst_10 = arith.constant 1.000000e+00 : f32
    %15 = vector.broadcast %cst_10 : f32 to vector<1x128xf32>
    %16 = arith.addf %15, %14 : vector<1x128xf32>
    %17 = arith.divf %15, %16 : vector<1x128xf32>
    %c0_11 = arith.constant 0 : index
    %c0_12 = arith.constant 0 : index
    %18 = vector.load %arg6[%c0_11, %c0_12] : memref<1x128xf32, #tpu.memory_space<vmem>>, vector<1x128xf32>
    tpu.vector_store %arg6[%c0_11, %c0_12], %17 {strides = array<i32>} : memref<1x128xf32, #tpu.memory_space<vmem>>, vector<1x128xf32>,
    return
  }
  func.func @transform_0(%arg0: i32) -> (i32, i32) {
    %c0_i32 = arith.constant 0 : i32
    %c0_i32_0 = arith.constant 0 : i32
    return %c0_i32, %arg0 : i32, i32
  }
  func.func @transform_1(%arg0: i32) -> (i32, i32) {
    %c0_i32 = arith.constant 0 : i32
    %c0_i32_0 = arith.constant 0 : i32
    %c0_i32_1 = arith.constant 0 : i32
    return %c0_i32, %c0_i32_0 : i32, i32
  }
  func.func @transform_2(%arg0: i32) -> (i32, i32) {
    %c0_i32 = arith.constant 0 : i32
    %c0_i32_0 = arith.constant 0 : i32
    %c0_i32_1 = arith.constant 0 : i32
    return %c0_i32, %c0_i32_0 : i32, i32
  }
  func.func @transform_3(%arg0: i32) -> (i32, i32) {
    %c0_i32 = arith.constant 0 : i32
    %c0_i32_0 = arith.constant 0 : i32
    %c0_i32_1 = arith.constant 0 : i32
    return %c0_i32, %c0_i32_0 : i32, i32
  }
  func.func @transform_4(%arg0: i32) -> i32 {
    %c0_i32 = arith.constant 0 : i32
    %c0_i32_0 = arith.constant 0 : i32
    return %c0_i32 : i32
  }
  func.func @transform_5(%arg0: i32) -> (i32, i32) {
    %c0_i32 = arith.constant 0 : i32
    %c0_i32_0 = arith.constant 0 : i32
    return %c0_i32, %arg0 : i32, i32
  }
}

</mosaic_0001>

<bundles_post_ra>
// kernel: tpu_custom_call.1
= control target key start
LH: loop header
LB: loop body
LE: loop exit
PB: predicated region body
PF: predicated region fallthrough
CT: control target
= control target key end

     0   :  { %11 = vsyncpa [#allocation4], 0  ;;  %s332_s0 = inlined_call_operand.vmem [shape: f32[32,128], index: 0, kind: input, shape index: {}]   ;;  %s333_s1 = inlined_call_operand.hbm [shape: f32[32,32], index: 1, kind: input, shape index: {}]   ;;  %s334_s2 = inlined_call_operand.vmem [shape: f32[32,1], index: 2, kind: input, shape index: {}]   ;;  %s335_s3 = inlined_call_operand.vmem [shape: f32[1,32], index: 3, kind: input, shape index: {}]   ;;  %s336_s4 = inlined_call_operand.<no memory space> [shape: f32[1], index: 4, kind: input, shape index: {}]   ;;  %s337_s5 = inlined_call_operand.hbm [shape: f32[1,128], index: 5, kind: output, shape index: {}]  }
   0x1   :  { %12 = vsyncpa [#allocation5], 0  ;;  %s19_s20 = sshll.u32 %s333_s1, 4  ;;  %s256_s21 = smov [#allocation3]   ;;  %s20_s20 = int_to_ptr.hbm [resolvable:$true] %s19_s20 }
   0x2   :  { %s21_s22 = sshll.u32 %s256_s21, 4  ;;  %s257_s23 = smov 128   ;;  %s22_s22 = int_to_ptr.vmem [resolvable:$true] %s21_s22 }
   0x3   :  { %s258_s24 = smov 8  }
   0x4   :  { %27 = dma.hbm_to_vmem [thread:$0]  %s20_s20, 512, %s22_s22, [#allocation4], %s257_s23, %s257_s23, %s258_s24  }
   0x5   :  { %252 = dma.done.wait [#allocation4], 512  }
   0x6   :  { %253 = vsyncadd [#allocation4], 4294966784  ;;  %v259_v0 = vmov 0   ;;  %v41_v1 = vld [vmem:[%s332_s0 + $0x18] sm:$0xff]  ;;  %v40_v2 = vld [vmem:[%s332_s0 + $0x10] sm:$0xff]  ;;  %vm70_vm0 = vcmask 261120   ;;  %v118_v30 = vstv %s336_s4 }
   0x7   :  { %198 = vset.pattern.permute.xlu0 %v259_v0  ;;  %199 = vset.pattern.permute.xlu1 %v259_v0  ;;  %v39_v3 = vld [vmem:[%s332_s0 + $0x8] sm:$0xff]  ;;  %v49_v4 = vld [vmem:[%s334_s2 + $0x18] sm:$0xff]  ;;  %v38_v6 = vld [vmem:[%s332_s0] sm:$0xff]  ;;  %s169_s4 = sshll.u32 %s337_s5, 4  ;;  %s170_s4 = int_to_ptr.hbm [resolvable:$true] %s169_s4 }
   0x8   :  { %186 = vmatpush.msra.mxu3 %v41_v1  ;;  %185 = vmatpush.msra.mxu2 %v41_v1  ;;  %v47_v5 = vld [vmem:[%s334_s2 + $0x8] sm:$0xff]  ;;  %v44_v7 = vld [vmem:[#allocation3 + $0x10] sm:$0xff]  ;;  %v42_v9 = vld [vmem:[#allocation3] sm:$0xff] }
   0x9   :  { %95 = vmatpush.msra.mxu0 %v41_v1  ;;  %67 = vperm.xlu0 %198, %v49_v4   ;;  %v43_v8 = vld [vmem:[#allocation3 + $0x8] sm:$0xff]  ;;  %v48_v10 = vld [vmem:[%s334_s2 + $0x10] sm:$0xff]  ;;  %v46_v11 = vld [vmem:[%s334_s2] sm:$0xff] }
   0xa   :  { %188 = vmatpush.msra.mxu3 %v40_v2  ;;  %187 = vmatpush.msra.mxu2 %v40_v2  ;;  %v45_v12 = vld [vmem:[#allocation3 + $0x18] sm:$0xff]  ;;  %v116_v29 = vld [vmem:[%s335_s3] sm:$0x1]  ;;  %s260_s3 = smov [#allocation6]  }
   0xb   :  { %96 = vmatpush.msra.mxu0 %v40_v2  ;;  %57 = vperm.xlu1 %199, %v47_v5   ;;  %s167_s17 = sshll.u32 %s260_s3, 4  ;;  %s168_s17 = int_to_ptr.vmem [resolvable:$true] %s167_s17 }
   0xc   :  { %190 = vmatpush.msra.mxu3 %v39_v3  ;;  %189 = vmatpush.msra.mxu2 %v39_v3 }
   0xd   :  { %97 = vmatpush.msra.mxu0 %v39_v3 }
   0xe   :  { %192 = vmatpush.msra.mxu3 %v38_v6  ;;  %191 = vmatpush.msra.mxu2 %v38_v6 }
   0xf   :  { %181 = vmatmul.msk.f32.vlgmr.msra.gmra.mxu3 %vm70_vm0, %v44_v7  ;;  %180 = vmatmul.msk.f32.vlgmr.msra.gmra.mxu2 %vm70_vm0, %v43_v8 }
  0x10   :  { %98 = vmatpush.msra.mxu0 %v38_v6 }
  0x11   :  { %179 = vmatmul.msk.f32.vlgmr.msra.gmra.mxu0 %vm70_vm0, %v42_v9  ;;  %62 = vperm.xlu0 %198, %v48_v10  }
  0x13   :  { %52 = vperm.xlu1 %199, %v46_v11  }
  0x17   :  { %182 = vmatmul.msk.f32.gmra.mxu3 %vm70_vm0, %v45_v12 }
  0x7b   :  { %v68_v13 = vpop.permute.xlu0 %67 }
  0x7d   :  { %v58_v14 = vpop.permute.xlu1 %57 }
  0x83   :  { %v63_v16 = vpop.permute.xlu0 %62 }
  0x85   :  { %v53_v21 = vpop.permute.xlu1 %52 }
  0x8e   :  { %v100_v22 = vpop.f32.mrf.mxu0 }
  0x8f   :  { %v101_v26 = vadd.f32 %v100_v22, %v53_v21 }
  0x91   :  { %v112_v28 = vmax.f32 %v101_v26, 0.0 }
  0x92   :  { %v106_v15 = vpop.f32.mrf.mxu3  ;;  %v103_v17 = vpop.f32.mrf.mxu2 }
  0x93   :  { %v107_v19 = vadd.f32 %v106_v15, %v63_v16  ;;  %v104_v23 = vadd.f32 %v103_v17, %v58_v14 }
  0x95   :  { %v114_v25 = vmax.f32 %v107_v19, 0.0  ;;  %v113_v27 = vmax.f32 %v104_v23, 0.0 }
  0x9a   :  { %v109_v18 = vpop.f32.mrf.mxu3 }
  0x9b   :  { %v110_v20 = vadd.f32 %v109_v18, %v68_v13 }
  0x9d   :  { %v115_v24 = vmax.f32 %v110_v20, 0.0 }
  0x9f   :  { %134 = vmatpush.msra.mxu1 %v115_v24 }
  0xa1   :  { %135 = vmatpush.msra.mxu1 %v114_v25 }
  0xa3   :  { %136 = vmatpush.msra.mxu1 %v113_v27 }
  0xa5   :  { %137 = vmatpush.msra.mxu1 %v112_v28 }
  0xa6   :  { %183 = vmatmul.msk.f32.vlgmr.msra.gmra.mxu1 %vm70_vm0, %v116_v29 }
 0x123   :  { %v139_v31 = vpop.f32.mrf.mxu1 }
 0x124   :  { %v140_v32 = vadd.f32 %v139_v31, %v118_v30 }
 0x126   :  { %v184_v33 = vmul.f32 -1.442695, %v140_v32 }
 0x128   :  { %200 = vpow2.f32 %v184_v33 }
 0x12e   :  { %v201_v34 = vpop.eup %200 }
 0x12f   :  { %v145_v35 = vadd.f32 1.0, %v201_v34 }
 0x131   :  { %202 = vrcp.f32 %v145_v35  ;;  %v157_v39 = vand.u32 2147483648, %v145_v35  ;;  %v155_v41 = vand.u32 2147483647, %v145_v35  ;;  %vm151_vm2 = vweird.f32 %v145_v35 }
 0x133   :  { %v158_v43 = vor.u32 1.1754944e-38, %v157_v39  ;;  %vm156_vm4 = vcmp.eq.f32.partialorder %v155_v41, 8.507059e+37 }
 0x137   :  { %v203_v36 = vpop.eup %202 }
 0x138   :  { %v147_v37 = vmul.f32 %v203_v36, %v145_v35  ;;  %vm152_vm1 = vweird.f32 %v203_v36 }
 0x139   :  { %vm153_vm3 = vmor %vm151_vm2, %vm152_vm1 }
 0x13a   :  { %v148_v38 = vsub.f32 1.0, %v147_v37 }
 0x13c   :  { %v149_v40 = vmul.f32 %v203_v36, %v148_v38 }
 0x13e   :  { %v150_v42 = vadd.f32 %v203_v36, %v149_v40 }
 0x140   :  { %v154_v44 = vsel %vm153_vm3, %v203_v36, %v150_v42 }
 0x141   :  { %v159_v45 = vsel %vm156_vm4, %v158_v43, %v154_v44 }
 0x142   :  { %161 = vst [vmem:[#allocation6] sm:$0x1] %v159_v45 }
 0x143   :  { %172 = dma.vmem_to_hbm [thread:$0]  %s168_s17, 16, %s170_s4, [#allocation5]  }
 0x144   :  { %254 = dma.done.wait [#allocation5], 16  }
 0x145   :  { %255 = vsyncadd [#allocation5], 4294967280 }
 0x146   :  { %177 = vsyncpa [#allocation4], 1 }
 0x147   :  { %178 = vsyncpa [#allocation5], 1 }

</bundles_post_ra>
